<compile_context>
chip_gen: v7x
topology: tpu7x:2x2x1
jax: 0.10.0
libtpu: 0.0.40
codegen_flags: <defaults>
</compile_context>

<pallas_src>
import math

import jax
import jax.numpy as jnp
from jax.experimental import pallas as pl
from jax.experimental.pallas import tpu as pltpu


def _rotary_kernel(scale_ref, offset_ref, out_ref):
    """out[r, l] = (global_row(r) * fold + l // dim) * inv_freq_full[l % dim]

    scale_ref:  (1, width) f32  = fold * tile(inv_freq_full, fold)
    offset_ref: (1, width) f32  = (lane // dim) * tile(inv_freq_full, fold)
    out_ref:    (tile_rows, width)  output tile (lane-dense, width % 128 == 0)
    """
    tile_rows, width = out_ref.shape
    base = (pl.program_id(0) * tile_rows).astype(jnp.float32)
    row = jax.lax.broadcasted_iota(jnp.int32, (tile_rows, width), 0).astype(
        jnp.float32)
    # (base + r) * fold * inv_freq + (lane//dim) * inv_freq
    #   == ((base + r) * fold + lane//dim) * inv_freq        (the desired t * f)
    out_ref[...] = ((row + base) * scale_ref[...] + offset_ref[...]).astype(
        out_ref.dtype)


def _target_tile_bytes() -> int:
    """Per-tile writeback target.

    v7x (64 MiB VMEM / ~3.2 TB/s HBM): 8 MiB tiles keep the ~0.35 us per-step
    cost <~12%; 2 x 8 MiB double-buffered output still fits the 32 MiB default
    scoped-VMEM limit.  v5e/v6e: 4 MiB already sits on the write roofline and
    2 x 4 MiB stays under v5e's 16 MiB default scoped limit.
    """
    try:
        info = pltpu.get_tpu_info()
        vmem_bytes = getattr(info, "vmem_capacity_bytes", None)
        if vmem_bytes is not None and vmem_bytes <= 64 * 1024 * 1024:
            return 8 * 1024 * 1024
    except Exception:  # conservative fallback (e.g. interpret mode / CPU AOT)
        pass
    return 4 * 1024 * 1024


def _choose_tile_rows(packed_rows: int, width: int, target_bytes: int) -> int:
    """Near-equal blocks, grid length (almost always) a multiple of 2.

    Picks the smallest k such that a 2k-way split of the packed rows (rounded
    up to a sublane multiple of 8) fits under the per-tile VMEM target, so both
    v7x TensorCores get balanced work.  No effect on v5e/v6e (1 TC).
    """
    row_bytes = width * 4
    max_rows = max(8, (target_bytes // row_bytes) // 8 * 8)
    if packed_rows <= 8:
        return packed_rows  # single full-extent block (exempt from /8 rule)
    k = 1
    while True:
        rows = -(-packed_rows // (2 * k))   # ceil split into 2k pieces
        rows = -(-rows // 8) * 8            # round up to sublane multiple
        if rows <= max_rows or rows <= 8:
            break
        k += 1
    if rows >= packed_rows:
        return packed_rows
    return rows


def rotary_embedding(seq_len: int, dim: int, theta: float = 10000.0,
                     out_dtype=jnp.float32) -> jax.Array:
    """Returns the (seq_len, dim) rotary frequency table (float32 by default)."""
    assert dim % 2 == 0, "dim must be even"

    # Buffer setup, identical to nn.Module.__init__ (deterministic).
    inv_freq = 1.0 / (theta ** (jnp.arange(0, dim, 2, dtype=jnp.float32) / dim))
    inv_freq_full = jnp.concatenate([inv_freq, inv_freq])      # (dim,) == cat

    # Lane-dense folding: pack `fold` consecutive seq rows into the lane axis
    # so the output block's last dim is a multiple of 128 (unmasked vst).
    # Generalized: width = lcm(dim, 128) handles dims that don't divide 128.
    g = math.gcd(dim, 128)
    fold = 1 if dim % 128 == 0 else 128 // g
    width = dim * fold

    packed_rows = -(-seq_len // fold)        # ceil(seq_len / fold)
    padded_seq = packed_rows * fold

    inv_freq_tiled = jnp.tile(inv_freq_full, fold)             # (width,)
    scale = (float(fold) * inv_freq_tiled).reshape(1, width)
    lane_sub = (jnp.arange(width, dtype=jnp.int32) // dim).astype(jnp.float32)
    offset = (lane_sub * inv_freq_tiled).reshape(1, width)

    tile_rows = _choose_tile_rows(packed_rows, width, _target_tile_bytes())
    grid = (pl.cdiv(packed_rows, tile_rows),)

    # Note: the two (1, width) inputs have a constant block index, so Pallas
    # keeps them resident in VMEM instead of re-DMA'ing them every grid step.
    out_packed = pl.pallas_call(
        _rotary_kernel,
        out_shape=jax.ShapeDtypeStruct((packed_rows, width), out_dtype),
        grid=grid,
        in_specs=[pl.BlockSpec((1, width), lambda i: (0, 0)),
                  pl.BlockSpec((1, width), lambda i: (0, 0))],
        out_specs=pl.BlockSpec((tile_rows, width), lambda i: (i, 0)),
        compiler_params=pltpu.CompilerParams(
            dimension_semantics=("parallel",)),
        cost_estimate=pl.CostEstimate(
            flops=3 * packed_rows * width,
            transcendentals=0,
            bytes_accessed=packed_rows * width * jnp.dtype(out_dtype).itemsize
            + 2 * width * 4),
    )(scale, offset)

    out = out_packed.reshape(padded_seq, dim)
    if padded_seq != seq_len:
        out = out[:seq_len]
    return out


def _reference(seq_len: int, dim: int, theta: float) -> jax.Array:
    """Pure-JAX replica of the PyTorch forward."""
    inv_freq = 1.0 / (theta ** (jnp.arange(0, dim, 2, dtype=jnp.float32) / dim))
    t = jnp.arange(seq_len, dtype=jnp.float32)
    freqs = jnp.einsum("i,j->ij", t, inv_freq)
    return jnp.concatenate([freqs, freqs], axis=-1)


if __name__ == "__main__":
    # The module's only forward input is seq_len and its buffer is
    # deterministic; PRNGKey kept for harness conformity.
    _ = jax.random.PRNGKey(0)

    theta = 10000.0
    cases = [
        (8, 32),       # small-shape case from the module spec (lane-folded)
        (10, 32),      # seq_len not a multiple of the fold factor (padded tail)
        (257, 96),     # dim not dividing 128 -> generalized lcm fold (fold=4)
        (2048, 128),   # dim % 128 == 0 -> fold=1, balanced 2-step grid
    ]
    for seq_len, dim in cases:
        out = jax.block_until_ready(rotary_embedding(seq_len, dim, theta))
        expected = _reference(seq_len, dim, theta)
        assert out.shape == (seq_len, dim), (out.shape, seq_len, dim)
        assert out.dtype == jnp.float32
        assert jnp.allclose(out, expected, rtol=1e-6, atol=1e-6), (seq_len, dim)

    print("KERNEL_OK")
</pallas_src>

<mosaic_0001>
module attributes {stable_mosaic.version = 11 : i64} {
  func.func @_rotary_kernel(%arg0: i32, %arg1: memref<1x128xf32, #tpu.memory_space<vmem>>, %arg2: memref<1x128xf32, #tpu.memory_space<vmem>>, %arg3: memref<2x128xf32, #tpu.memory_space<vmem>>) attributes {dimension_semantics = [#tpu.dimension_semantics<parallel>], iteration_bounds = array<i64: 1>, scalar_prefetch = 0 : i64, scratch_operands = 0 : i64, tpu.core_type = #tpu.core_type<tc>, window_params = [{pipeline_mode = #tpu.pipeline_mode<synchronous>, transform_indices = @transform_0, window_bounds = array<i64: 1, 128>}, {pipeline_mode = #tpu.pipeline_mode<synchronous>, transform_indices = @transform_1, window_bounds = array<i64: 1, 128>}, {transform_indices = @transform_2, window_bounds = array<i64: 2, 128>}]} {
    %c2_i32 = arith.constant 2 : i32
    %0 = arith.muli %arg0, %c2_i32 : i32
    %1 = arith.sitofp %0 : i32 to f32
    %2 = tpu.iota {dimensions = array<i32: 0>} : vector<2x128xi32>
    %3 = arith.sitofp %2 : vector<2x128xi32> to vector<2x128xf32>
    %4 = vector.broadcast %1 : f32 to vector<2x128xf32>
    %5 = arith.addf %3, %4 : vector<2x128xf32>
    %c0 = arith.constant 0 : index
    %c0_0 = arith.constant 0 : index
    %6 = vector.load %arg1[%c0, %c0_0] : memref<1x128xf32, #tpu.memory_space<vmem>>, vector<1x128xf32>
    %7 = vector.broadcast %6 : vector<1x128xf32> to vector<2x128xf32>
    %8 = arith.mulf %5, %7 : vector<2x128xf32>
    %c0_1 = arith.constant 0 : index
    %c0_2 = arith.constant 0 : index
    %9 = vector.load %arg2[%c0_1, %c0_2] : memref<1x128xf32, #tpu.memory_space<vmem>>, vector<1x128xf32>
    %10 = vector.broadcast %9 : vector<1x128xf32> to vector<2x128xf32>
    %11 = arith.addf %8, %10 : vector<2x128xf32>
    %c0_3 = arith.constant 0 : index
    %c0_4 = arith.constant 0 : index
    %12 = vector.load %arg3[%c0_3, %c0_4] : memref<2x128xf32, #tpu.memory_space<vmem>>, vector<2x128xf32>
    tpu.vector_store %arg3[%c0_3, %c0_4], %11 {strides = array<i32>} : memref<2x128xf32, #tpu.memory_space<vmem>>, vector<2x128xf32>,
    return
  }
  func.func @transform_0(%arg0: i32) -> (i32, i32) {
    %c0_i32 = arith.constant 0 : i32
    %c0_i32_0 = arith.constant 0 : i32
    %c0_i32_1 = arith.constant 0 : i32
    return %c0_i32, %c0_i32_0 : i32, i32
  }
  func.func @transform_1(%arg0: i32) -> (i32, i32) {
    %c0_i32 = arith.constant 0 : i32
    %c0_i32_0 = arith.constant 0 : i32
    %c0_i32_1 = arith.constant 0 : i32
    return %c0_i32, %c0_i32_0 : i32, i32
  }
  func.func @transform_2(%arg0: i32) -> (i32, i32) {
    %c0_i32 = arith.constant 0 : i32
    %c0_i32_0 = arith.constant 0 : i32
    return %arg0, %c0_i32 : i32, i32
  }
}

</mosaic_0001>

<bundles_post_ra>
// kernel: tpu_custom_call.1
= control target key start
LH: loop header
LB: loop body
LE: loop exit
PB: predicated region body
PF: predicated region fallthrough
CT: control target
= control target key end

     0   :  { %7 = vsyncpa [#allocation3], 0  ;;  %s159_s0 = inlined_call_operand.hbm [shape: f32[1,128], index: 0, kind: input, shape index: {}]   ;;  %s160_s1 = inlined_call_operand.vmem [shape: f32[1,128], index: 1, kind: input, shape index: {}]   ;;  %s161_s2 = inlined_call_operand.hbm [shape: f32[2,128], index: 2, kind: output, shape index: {}]  }
   0x1   :  { %8 = vsyncpa [#allocation4], 0  ;;  %s115_s9 = smov [#allocation2]   ;;  %s67_s13 = scalar_lea.hbm %s159_s0, 16 }
   0x2   :  { %s15_s10 = sshll.u32 %s115_s9, 4  ;;  %p68_p0 = scmp.ne.s32.totalorder %s159_s0, %s67_s13  ;;  %s16_s10 = int_to_ptr.vmem [resolvable:$true] %s15_s10 }
   0x3   :  { %p71_p1 = scmp.lt.u32.totalorder %s67_s13, %s159_s0 }
   0x5   :  { %p73_p2 = pnand %p71_p1, %p68_p0 }
   0x7   :  { %76 = shalt.err (!%p73_p2)
}
   0x8   :  { %s77_s18 = scalar_lea.vmem %s16_s10, 16  ;;  %s81_s19 = scalar_lea.vmem %s16_s10, 32 }
   0x9   :  { %p78_p3 = scmp.ne.s32.totalorder %s16_s10, %s77_s18  ;;  %p82_p4 = scmp.lt.s32.totalorder %s16_s10, %s16_s10 }
   0xa   :  { %p83_p5 = scmp.lt.s32.totalorder %s81_s19, %s77_s18 }
   0xc   :  { %p84_p6 = por %p83_p5, %p82_p4 }
   0xe   :  { %p85_p7 = pnand %p84_p6, %p78_p3 }
  0x10   :  { %88 = shalt.err (!%p85_p7)
}
  0x11   :  { %18 = dma.hbm_to_vmem [thread:$0]  %s159_s0, 16, %s16_s10, [#allocation3]  }
  0x12   :  { %111 = dma.done.wait [#allocation3], 16  }
  0x13   :  { %112 = vsyncadd [#allocation3], 4294967280  ;;  %v26_v0 = vlaneseq  ;;  %v63_v3 = vld [vmem:[#allocation2] ss:$0 sm:$0xff]  ;;  %s116_s24 = smov [#allocation5]  }
  0x14   :  { %v64_v4 = vld [vmem:[%s160_s1] ss:$0 sm:$0xff]  ;;  %s54_s25 = sshll.u32 %s116_s24, 4  ;;  %s55_s25 = int_to_ptr.vmem [resolvable:$true] %s54_s25 }
  0x15   :  { %v27_v1 = vshrl.u32 %v26_v0, 7  ;;  %s89_s26 = scalar_lea.vmem %s55_s25, 32  ;;  %p94_p9 = scmp.lt.s32.totalorder %s55_s25, %s55_s25 }
  0x16   :  { %p90_p8 = scmp.ne.s32.totalorder %s55_s25, %s89_s26  ;;  %p95_p10 = scmp.lt.s32.totalorder %s89_s26, %s89_s26 }
  0x17   :  { %v28_v2 = vcvt.s32.f32 %v27_v1 }
  0x18   :  { %p96_p11 = por %p95_p10, %p94_p9 }
  0x19   :  { %v38_v5 = vmul.f32 %v63_v3, %v28_v2 }
  0x1a   :  { %p97_p12 = pnand %p96_p11, %p90_p8 }
  0x1b   :  { %v46_v6 = vadd.f32 %v64_v4, %v38_v5 }
  0x1d   :  { %47 = vst [vmem:[#allocation5] sm:$0x3] %v46_v6 }
  0x1e   :  { %100 = shalt.err (!%p97_p12)
}
  0x1f   :  { %s101_s28 = scalar_lea.hbm %s161_s2, 32 }
  0x20   :  { %p102_p13 = scmp.ne.s32.totalorder %s161_s2, %s101_s28  ;;  %p105_p0 = scmp.lt.u32.totalorder %s101_s28, %s161_s2 }
  0x22   :  { %p107_p1 = pnand %p105_p0, %p102_p13 }
  0x24   :  { %110 = shalt.err (!%p107_p1)
}
  0x25   :  { %57 = dma.vmem_to_hbm [thread:$0]  %s55_s25, 32, %s161_s2, [#allocation4]  }
  0x26   :  { %113 = dma.done.wait [#allocation4], 32  }
  0x27   :  { %114 = vsyncadd [#allocation4], 4294967264 }
  0x28   :  { %61 = vsyncpa [#allocation3], 1 }
  0x29   :  { %62 = vsyncpa [#allocation4], 1 }

</bundles_post_ra>
